<compile_context>
chip_gen: v5e
topology: v5e:2x2
jax: 0.10.0
libtpu: 0.0.40
codegen_flags: <defaults>
</compile_context>

<pallas_src>
import jax
import jax.numpy as jnp
from jax.experimental import pallas as pl
from jax.experimental.pallas import tpu as pltpu


# ---------------------------------------------------------------------------
# Config (synthetic, deterministic): n_obs=8, hidden_neurons=[32, 32],
# activation=['tanh','tanh'], mul branch width 5.
# ---------------------------------------------------------------------------
N_OBS = 8
HIDDEN = (32, 32)          # must be equal so one lane mask covers both layers
MUL_HIDDEN = 5
BATCH = 8

WIDTH = 128                # lane-padded feature width used everywhere in-kernel
SEQ_W = HIDDEN[0]          # 32: cols [0:32] = seq features, [32:37] = mul features

# Row offsets of each packed parameter inside the single slab (8-row aligned).
R_WIN = 0                            # [N_OBS, 128] fused first-layer weight
R_BIN = 8                            # row 8: fused first-layer bias
R_WMID = 16                          # [128, 128] layer2 weight + identity carry
R_BMID = R_WMID + WIDTH              # 144: layer2 bias row
R_WOUT = R_BMID + 8                  # 152: [128, 128] fused output projection
R_BOUT = R_WOUT + WIDTH              # 280: fused output bias row
SLAB_ROWS = R_BOUT + 8               # 288 rows x 128 lanes x 4 B = 144 KiB


def net_kernel(x_ref, slab_ref, out_ref):
    x = x_ref[...]                                        # [TB, N_OBS]

    w_in = slab_ref[R_WIN:R_WIN + N_OBS, :]               # [N_OBS, 128]
    b_in = slab_ref[R_BIN:R_BIN + 1, :]                   # [1, 128]
    w_mid = slab_ref[R_WMID:R_WMID + WIDTH, :]            # [128, 128]
    b_mid = slab_ref[R_BMID:R_BMID + 1, :]                # [1, 128]
    w_out = slab_ref[R_WOUT:R_WOUT + WIDTH, :]            # [128, 128]
    b_out = slab_ref[R_BOUT:R_BOUT + 1, :]                # [1, 128]

    # Per-lane activation select: cols < 32 -> tanh (seq branch),
    # cols >= 32 -> square / identity-carry (mul branch; padding lanes stay 0).
    col = jax.lax.broadcasted_iota(jnp.int32, (x.shape[0], WIDTH), 1)
    is_seq = col < SEQ_W

    # fused layer 1 (both branches share LHS x)
    z = jnp.dot(x, w_in, preferred_element_type=jnp.float32) + b_in
    a1 = jnp.where(is_seq, jnp.tanh(z), z * z)            # tanh | Square()

    # fused layer 2: seq Linear+tanh; mul features carried by identity block
    h = jnp.dot(a1, w_mid, preferred_element_type=jnp.float32) + b_mid
    a2 = jnp.where(is_seq, jnp.tanh(h), h)

    # fused output projection: col 0 = seq head, col 1 = mul head
    out_ref[...] = jnp.dot(a2, w_out, preferred_element_type=jnp.float32) + b_out


def pack_params(p):
    """Pack all weights/biases into one lane-dense, 8-row-aligned f32 slab."""
    h1, h2, m1 = HIDDEN[0], HIDDEN[1], MUL_HIDDEN
    slab = jnp.zeros((SLAB_ROWS, WIDTH), jnp.float32)
    # fused first layer: cols [0:32] seq, [32:37] mul
    slab = slab.at[R_WIN:R_WIN + N_OBS, 0:h1].set(p["w1"])
    slab = slab.at[R_WIN:R_WIN + N_OBS, h1:h1 + m1].set(p["wm1"])
    slab = slab.at[R_BIN, 0:h1].set(p["b1"][0])
    slab = slab.at[R_BIN, h1:h1 + m1].set(p["bm1"][0])
    # fused middle layer: seq layer 2 + identity carry for mul features
    slab = slab.at[R_WMID:R_WMID + h1, 0:h2].set(p["w2"])
    slab = slab.at[R_WMID + h1:R_WMID + h1 + m1,
                   h1:h1 + m1].set(jnp.eye(m1, dtype=jnp.float32))
    slab = slab.at[R_BMID, 0:h2].set(p["b2"][0])
    # fused output projection: col 0 = seq head, col 1 = mul head
    slab = slab.at[R_WOUT:R_WOUT + h2, 0:1].set(p["w3"])
    slab = slab.at[R_WOUT + h2:R_WOUT + h2 + m1, 1:2].set(p["wm2"])
    slab = slab.at[R_BOUT, 0].set(p["b3"][0, 0])
    slab = slab.at[R_BOUT, 1].set(p["bm2"][0, 0])
    return slab


def net_forward(x, slab):
    """x: [B, N_OBS] f32, slab: packed params. Returns (seq_out [B,1], mul_out [B,1])."""
    B = x.shape[0]
    TB = B if B <= 512 else 512        # batch tile (>=512 amortizes per-step overhead)
    assert B % TB == 0, "batch must be a multiple of the batch tile"
    out = pl.pallas_call(
        net_kernel,
        out_shape=jax.ShapeDtypeStruct((B, WIDTH), jnp.float32),
        grid=(B // TB,),
        in_specs=[
            pl.BlockSpec((TB, N_OBS), lambda i: (i, 0)),        # x tile
            pl.BlockSpec((SLAB_ROWS, WIDTH), lambda i: (0, 0)),  # params, VMEM-resident
        ],
        out_specs=pl.BlockSpec((TB, WIDTH), lambda i: (i, 0)),   # lane-dense output
        compiler_params=pltpu.CompilerParams(
            dimension_semantics=("parallel",)),
    )(x, slab)
    return out[:, 0:1], out[:, 1:2]


def init_params(key):
    """Deterministic init mimicking nn.Linear's U(-1/sqrt(fan_in), 1/sqrt(fan_in))."""
    def linear(key, fan_in, fan_out):
        kw, kb = jax.random.split(key)
        bound = 1.0 / jnp.sqrt(float(fan_in))
        w = jax.random.uniform(kw, (fan_in, fan_out), jnp.float32, -bound, bound)
        b = jax.random.uniform(kb, (1, fan_out), jnp.float32, -bound, bound)
        return w, b

    keys = jax.random.split(key, 5)
    w1, b1 = linear(keys[0], N_OBS, HIDDEN[0])
    w2, b2 = linear(keys[1], HIDDEN[0], HIDDEN[1])
    w3, b3 = linear(keys[2], HIDDEN[1], 1)
    wm1, bm1 = linear(keys[3], N_OBS, MUL_HIDDEN)
    wm2, bm2 = linear(keys[4], MUL_HIDDEN, 1)
    return dict(w1=w1, b1=b1, w2=w2, b2=b2, w3=w3, b3=b3,
                wm1=wm1, bm1=bm1, wm2=wm2, bm2=bm2)


def net_forward_ref(x, p):
    """Plain-JAX reference of the same forward pass (unfused)."""
    h = jnp.tanh(x @ p["w1"] + p["b1"])
    h = jnp.tanh(h @ p["w2"] + p["b2"])
    seq_out = h @ p["w3"] + p["b3"]
    y = (x @ p["wm1"] + p["bm1"]) ** 2         # Square()
    mul_out = y @ p["wm2"] + p["bm2"]
    return seq_out, mul_out


if __name__ == "__main__":
    key = jax.random.PRNGKey(0)
    kx, kp = jax.random.split(key)
    x = jax.random.normal(kx, (BATCH, N_OBS), jnp.float32)
    params = init_params(kp)
    slab = pack_params(params)

    seq_out, mul_out = net_forward(x, slab)
    jax.block_until_ready((seq_out, mul_out))

    # sanity check against pure-JAX reference
    ref_seq, ref_mul = net_forward_ref(x, params)
    assert seq_out.shape == (BATCH, 1) and mul_out.shape == (BATCH, 1)
    assert jnp.allclose(seq_out, ref_seq, atol=1e-5, rtol=1e-5)
    assert jnp.allclose(mul_out, ref_mul, atol=1e-5, rtol=1e-5)

    print("KERNEL_OK")
</pallas_src>

<mosaic_0001>
module attributes {stable_mosaic.version = 11 : i64} {
  func.func @net_kernel(%arg0: i32, %arg1: memref<8x8xf32, #tpu.memory_space<vmem>>, %arg2: memref<288x128xf32, #tpu.memory_space<vmem>>, %arg3: memref<8x128xf32, #tpu.memory_space<vmem>>) attributes {dimension_semantics = [#tpu.dimension_semantics<parallel>], iteration_bounds = array<i64: 1>, scalar_prefetch = 0 : i64, scratch_operands = 0 : i64, tpu.core_type = #tpu.core_type<tc>, window_params = [{transform_indices = @transform_0, window_bounds = array<i64: 8, 8>}, {pipeline_mode = #tpu.pipeline_mode<synchronous>, transform_indices = @transform_1, window_bounds = array<i64: 288, 128>}, {transform_indices = @transform_2, window_bounds = array<i64: 8, 128>}]} {
    %c0 = arith.constant 0 : index
    %c0_0 = arith.constant 0 : index
    %0 = vector.load %arg1[%c0, %c0_0] : memref<8x8xf32, #tpu.memory_space<vmem>>, vector<8x8xf32>
    %c0_1 = arith.constant 0 : index
    %c0_2 = arith.constant 0 : index
    %1 = vector.load %arg2[%c0_1, %c0_2] : memref<288x128xf32, #tpu.memory_space<vmem>>, vector<8x128xf32>
    %c8 = arith.constant 8 : index
    %c0_3 = arith.constant 0 : index
    %2 = vector.load %arg2[%c8, %c0_3] : memref<288x128xf32, #tpu.memory_space<vmem>>, vector<1x128xf32>
    %c16 = arith.constant 16 : index
    %c0_4 = arith.constant 0 : index
    %3 = vector.load %arg2[%c16, %c0_4] : memref<288x128xf32, #tpu.memory_space<vmem>>, vector<128x128xf32>
    %c144 = arith.constant 144 : index
    %c0_5 = arith.constant 0 : index
    %4 = vector.load %arg2[%c144, %c0_5] : memref<288x128xf32, #tpu.memory_space<vmem>>, vector<1x128xf32>
    %c152 = arith.constant 152 : index
    %c0_6 = arith.constant 0 : index
    %5 = vector.load %arg2[%c152, %c0_6] : memref<288x128xf32, #tpu.memory_space<vmem>>, vector<128x128xf32>
    %c280 = arith.constant 280 : index
    %c0_7 = arith.constant 0 : index
    %6 = vector.load %arg2[%c280, %c0_7] : memref<288x128xf32, #tpu.memory_space<vmem>>, vector<1x128xf32>
    %7 = tpu.iota {dimensions = array<i32: 1>} : vector<8x128xi32>
    %c32_i32 = arith.constant 32 : i32
    %8 = vector.broadcast %c32_i32 : i32 to vector<8x128xi32>
    %9 = arith.cmpi slt, %7, %8 : vector<8x128xi32>
    %cst = arith.constant dense<0.000000e+00> : vector<8x128xf32>
    %10 = tpu.matmul %0, %1, %cst {dimension_numbers = #tpu.dot_dimension_numbers<[1], [0], [0], [1], [0, 0, 1, 1], [], []>} : vector<8x8xf32>, vector<8x128xf32>, vector<8x128xf32> -> vector<8x128xf32>
    %11 = vector.broadcast %2 : vector<1x128xf32> to vector<8x128xf32>
    %12 = arith.addf %10, %11 : vector<8x128xf32>
    %13 = math.tanh %12 : vector<8x128xf32>
    %14 = arith.mulf %12, %12 : vector<8x128xf32>
    %15 = arith.select %9, %13, %14 : vector<8x128xi1>, vector<8x128xf32>
    %cst_8 = arith.constant dense<0.000000e+00> : vector<8x128xf32>
    %16 = tpu.matmul %15, %3, %cst_8 {dimension_numbers = #tpu.dot_dimension_numbers<[1], [0], [0], [1], [0, 0, 1, 1], [], []>} : vector<8x128xf32>, vector<128x128xf32>, vector<8x128xf32> -> vector<8x128xf32>
    %17 = vector.broadcast %4 : vector<1x128xf32> to vector<8x128xf32>
    %18 = arith.addf %16, %17 : vector<8x128xf32>
    %19 = math.tanh %18 : vector<8x128xf32>
    %20 = arith.select %9, %19, %18 : vector<8x128xi1>, vector<8x128xf32>
    %cst_9 = arith.constant dense<0.000000e+00> : vector<8x128xf32>
    %21 = tpu.matmul %20, %5, %cst_9 {dimension_numbers = #tpu.dot_dimension_numbers<[1], [0], [0], [1], [0, 0, 1, 1], [], []>} : vector<8x128xf32>, vector<128x128xf32>, vector<8x128xf32> -> vector<8x128xf32>
    %22 = vector.broadcast %6 : vector<1x128xf32> to vector<8x128xf32>
    %23 = arith.addf %21, %22 : vector<8x128xf32>
    %c0_10 = arith.constant 0 : index
    %c0_11 = arith.constant 0 : index
    %24 = vector.load %arg3[%c0_10, %c0_11] : memref<8x128xf32, #tpu.memory_space<vmem>>, vector<8x128xf32>
    tpu.vector_store %arg3[%c0_10, %c0_11], %23 {strides = array<i32>} : memref<8x128xf32, #tpu.memory_space<vmem>>, vector<8x128xf32>,
    return
  }
  func.func @transform_0(%arg0: i32) -> (i32, i32) {
    %c0_i32 = arith.constant 0 : i32
    %c0_i32_0 = arith.constant 0 : i32
    return %arg0, %c0_i32 : i32, i32
  }
  func.func @transform_1(%arg0: i32) -> (i32, i32) {
    %c0_i32 = arith.constant 0 : i32
    %c0_i32_0 = arith.constant 0 : i32
    %c0_i32_1 = arith.constant 0 : i32
    return %c0_i32, %c0_i32_0 : i32, i32
  }
  func.func @transform_2(%arg0: i32) -> (i32, i32) {
    %c0_i32 = arith.constant 0 : i32
    %c0_i32_0 = arith.constant 0 : i32
    return %arg0, %c0_i32 : i32, i32
  }
}

</mosaic_0001>

<bundles_post_ra>
// kernel: tpu_custom_call.1
= control target key start
LH: loop header
LB: loop body
LE: loop exit
PB: predicated region body
PF: predicated region fallthrough
CT: control target
= control target key end

     0   :  { %7 = vsyncpa [#allocation3], 0  ;;  %s295_s0 = inlined_call_operand.hbm [shape: f32[8,8], index: 0, kind: input, shape index: {}]   ;;  %s296_s1 = inlined_call_operand.hbm [shape: f32[288,128], index: 1, kind: input, shape index: {}]   ;;  %s297_s2 = inlined_call_operand.hbm [shape: f32[8,128], index: 2, kind: output, shape index: {}]  }
   0x1   :  { %8 = vsyncpa [#allocation6], 0 }
   0x2   :  { %9 = vsyncpa [#allocation4], 0  ;;  %s15_s11 = sshll.u32 %s295_s0, 4  ;;  %s264_s12 = smov [#allocation2]   ;;  %s16_s11 = int_to_ptr.hbm [resolvable:$true] %s15_s11 }
   0x3   :  { %s17_s13 = sshll.u32 %s264_s12, 4  ;;  %s25_s16 = sshll.u32 %s296_s1, 4  ;;  %s18_s13 = int_to_ptr.vmem [resolvable:$true] %s17_s13  ;;  %s26_s16 = int_to_ptr.hbm [resolvable:$true] %s25_s16 }
   0x4   :  { %20 = dma.hbm_to_vmem [thread:$0]  %s16_s11, 128, %s18_s13, [#allocation3]  }
   0x5   :  { %s265_s17 = smov [#allocation5]   ;;  %s266_s19 = smov 128  }
   0x6   :  { %s27_s18 = sshll.u32 %s265_s17, 4  ;;  %s267_s20 = smov 8   ;;  %s28_s18 = int_to_ptr.vmem [resolvable:$true] %s27_s18 }
   0x7   :  { %33 = dma.hbm_to_vmem [thread:$0]  %s26_s16, 4608, %s28_s18, [#allocation6], %s266_s19, %s266_s19, %s267_s20  }
   0x8   :  { %258 = dma.done.wait [#allocation3], 128  }
   0x9   :  { %259 = vsyncadd [#allocation3], 4294967168 }
   0xa   :  { %260 = dma.done.wait [#allocation6], 4608  }
   0xb   :  { %261 = vsyncadd [#allocation6], 4294962688  ;;  %vm83_vm0 = vcmask 64512   ;;  %v43_v0 = vld [vmem:[#allocation5] sm:$0xff]  ;;  %v42_v1 = vld [vmem:[#allocation2] sm:$0xff]  ;;  %v79_v29 = vlaneseq  ;;  %s268_s0 = smov [#allocation7]  }
   0xc   :  { %v60_v2 = vld [vmem:[#allocation5 + $0x88] sm:$0xff]  ;;  %102 = vmatpush.msra.mxu0 %v43_v0  ;;  %v59_v3 = vld [vmem:[#allocation5 + $0x80] sm:$0xff]  ;;  %v58_v4 = vld [vmem:[#allocation5 + $0x78] sm:$0xff]  ;;  %s160_s1 = sshll.u32 %s268_s0, 4  ;;  %s162_s23 = sshll.u32 %s297_s2, 4  ;;  %s161_s1 = int_to_ptr.vmem [resolvable:$true] %s160_s1  ;;  %s163_s23 = int_to_ptr.hbm [resolvable:$true] %s162_s23 }
   0xd   :  { %111 = vmatpush.msra.mxu1 %v60_v2  ;;  %173 = vmatmul.msk.f32.vlgmr.msra.gmra.mxu0 %vm83_vm0, %v42_v1  ;;  %v57_v5 = vld [vmem:[#allocation5 + $0x70] sm:$0xff]  ;;  %v56_v6 = vld [vmem:[#allocation5 + $0x68] sm:$0xff]  ;;  %v55_v7 = vld [vmem:[#allocation5 + $0x60] sm:$0xff]  ;;  %v80_v32 = vand.u32 127, %v79_v29 }
   0xe   :  { %v54_v8 = vld [vmem:[#allocation5 + $0x58] sm:$0xff]  ;;  %v53_v9 = vld [vmem:[#allocation5 + $0x50] sm:$0xff]  ;;  %v52_v10 = vld [vmem:[#allocation5 + $0x48] sm:$0xff] }
   0xf   :  { %112 = vmatpush.msra.mxu1 %v59_v3  ;;  %v51_v11 = vld [vmem:[#allocation5 + $0x40] sm:$0xff]  ;;  %v50_v12 = vld [vmem:[#allocation5 + $0x38] sm:$0xff]  ;;  %v49_v13 = vld [vmem:[#allocation5 + $0x30] sm:$0xff]  ;;  %vm81_vm1 = vcmp.lt.s32.totalorder %v80_v32, 32 }
  0x10   :  { %v48_v14 = vld [vmem:[#allocation5 + $0x28] sm:$0xff]  ;;  %v47_v15 = vld [vmem:[#allocation5 + $0x20] sm:$0xff]  ;;  %v46_v16 = vld [vmem:[#allocation5 + $0x18] sm:$0xff] }
  0x11   :  { %113 = vmatpush.msra.mxu1 %v58_v4  ;;  %v45_v17 = vld [vmem:[#allocation5 + $0x10] sm:$0xff]  ;;  %v76_v19 = vld [vmem:[#allocation5 + $0x108] sm:$0xff]  ;;  %v75_v20 = vld [vmem:[#allocation5 + $0x100] sm:$0xff] }
  0x12   :  { %v77_v18 = vld [vmem:[#allocation5 + $0x110] sm:$0xff]  ;;  %v74_v21 = vld [vmem:[#allocation5 + $0xf8] sm:$0xff]  ;;  %v72_v23 = vld [vmem:[#allocation5 + $0xe8] sm:$0xff] }
  0x13   :  { %114 = vmatpush.msra.mxu1 %v57_v5  ;;  %134 = vmatpush.msra.mxu2 %v77_v18  ;;  %v73_v22 = vld [vmem:[#allocation5 + $0xf0] sm:$0xff]  ;;  %v71_v24 = vld [vmem:[#allocation5 + $0xe0] sm:$0xff]  ;;  %v70_v25 = vld [vmem:[#allocation5 + $0xd8] sm:$0xff] }
  0x14   :  { %v69_v26 = vld [vmem:[#allocation5 + $0xd0] sm:$0xff]  ;;  %v68_v27 = vld [vmem:[#allocation5 + $0xc8] sm:$0xff]  ;;  %v67_v36 = vld [vmem:[#allocation5 + $0xc0] sm:$0xff] }
  0x15   :  { %115 = vmatpush.msra.mxu1 %v56_v6  ;;  %135 = vmatpush.msra.mxu2 %v76_v19  ;;  %v179_v28 = vld [vmem:[#allocation5 + $0x8] ss:$0 sm:$0xff]  ;;  %v66_v37 = vld [vmem:[#allocation5 + $0xb8] sm:$0xff]  ;;  %v65_v38 = vld [vmem:[#allocation5 + $0xb0] sm:$0xff] }
  0x16   :  { %v64_v39 = vld [vmem:[#allocation5 + $0xa8] sm:$0xff]  ;;  %v63_v40 = vld [vmem:[#allocation5 + $0xa0] sm:$0xff]  ;;  %v62_v41 = vld [vmem:[#allocation5 + $0x98] sm:$0xff] }
  0x17   :  { %116 = vmatpush.msra.mxu1 %v55_v7  ;;  %136 = vmatpush.msra.mxu2 %v75_v20  ;;  %v180_v42 = vld [vmem:[#allocation5 + $0x90] ss:$0 sm:$0xff]  ;;  %v181_v47 = vld [vmem:[#allocation5 + $0x118] ss:$0 sm:$0xff] }
  0x19   :  { %117 = vmatpush.msra.mxu1 %v54_v8  ;;  %137 = vmatpush.msra.mxu2 %v74_v21 }
  0x1b   :  { %118 = vmatpush.msra.mxu1 %v53_v9  ;;  %138 = vmatpush.msra.mxu2 %v73_v22 }
  0x1d   :  { %119 = vmatpush.msra.mxu1 %v52_v10  ;;  %139 = vmatpush.msra.mxu2 %v72_v23 }
  0x1f   :  { %120 = vmatpush.msra.mxu1 %v51_v11  ;;  %140 = vmatpush.msra.mxu2 %v71_v24 }
  0x21   :  { %121 = vmatpush.msra.mxu1 %v50_v12  ;;  %141 = vmatpush.msra.mxu2 %v70_v25 }
  0x23   :  { %122 = vmatpush.msra.mxu1 %v49_v13  ;;  %142 = vmatpush.msra.mxu2 %v69_v26 }
  0x25   :  { %123 = vmatpush.msra.mxu1 %v48_v14  ;;  %143 = vmatpush.msra.mxu2 %v68_v27 }
  0x27   :  { %124 = vmatpush.msra.mxu1 %v47_v15  ;;  %144 = vmatpush.msra.mxu2 %v67_v36 }
  0x29   :  { %125 = vmatpush.msra.mxu1 %v46_v16  ;;  %145 = vmatpush.msra.mxu2 %v66_v37 }
  0x2b   :  { %126 = vmatpush.msra.mxu1 %v45_v17  ;;  %146 = vmatpush.msra.mxu2 %v65_v38 }
  0x2d   :  { %147 = vmatpush.msra.mxu2 %v64_v39 }
  0x2f   :  { %148 = vmatpush.msra.mxu2 %v63_v40 }
  0x31   :  { %149 = vmatpush.msra.mxu2 %v62_v41 }
  0x8a   :  { %v104_v30 = vpop.f32.mrf.mxu0 }
  0x8b   :  { %v105_v31 = vadd.f32 %v179_v28, %v104_v30 }
  0x8d   :  { %182 = vtanh.f32 %v105_v31  ;;  %v108_v33 = vmul.f32 %v105_v31, %v105_v31 }
  0x93   :  { %v183_v34 = vpop.eup %182 }
  0x94   :  { %v109_v35 = vsel %vm81_vm1, %v183_v34, %v108_v33 }
  0x95   :  { %127 = vmatmul.f32.vlgmr.msra.gmra.mxu1 %v109_v35 }
 0x112   :  { %v128_v43 = vpop.f32.mrf.mxu1 }
 0x113   :  { %v129_v44 = vadd.f32 %v180_v42, %v128_v43 }
 0x115   :  { %184 = vtanh.f32 %v129_v44 }
 0x11b   :  { %v185_v45 = vpop.eup %184 }
 0x11c   :  { %v132_v46 = vsel %vm81_vm1, %v185_v45, %v129_v44 }
 0x11d   :  { %150 = vmatmul.f32.vlgmr.msra.gmra.mxu2 %v132_v46 }
 0x1a0   :  { %v151_v48 = vpop.f32.mrf.mxu2 }
 0x1a1   :  { %v152_v49 = vadd.f32 %v181_v47, %v151_v48 }
 0x1a3   :  { %154 = vst [vmem:[#allocation7] sm:$0xff] %v152_v49 }
 0x1a4   :  { %165 = dma.vmem_to_hbm [thread:$0]  %s161_s1, 128, %s163_s23, [#allocation4]  }
 0x1a5   :  { %262 = dma.done.wait [#allocation4], 128  }
 0x1a6   :  { %263 = vsyncadd [#allocation4], 4294967168 }
 0x1a7   :  { %170 = vsyncpa [#allocation3], 1 }
 0x1a8   :  { %171 = vsyncpa [#allocation6], 1 }
 0x1a9   :  { %172 = vsyncpa [#allocation4], 1 }

</bundles_post_ra>
